<compile_context>
chip_gen: v7x
topology: tpu7x:2x2x1
jax: 0.10.0
libtpu: 0.0.40
codegen_flags: <defaults>
</compile_context>

<pallas_src>
import functools

import jax
import jax.numpy as jnp
import numpy as np
from jax import lax
from jax.experimental import pallas as pl
from jax.experimental.pallas import tpu as pltpu


def _round_up(x, m):
    return (x + m - 1) // m * m


# ---------------- fused conv + bias + ReLU + 2x2 max-pool --------------------
def conv_pool_kernel(p_ref, w_ref, b_ref, o_ref, *, p2p):
    # p_ref: (CKK, 4*P2p)  im2col patches; 4 pool-window corners concatenated
    #                      along the lane axis, each chunk 128-aligned.
    # w_ref: (OC, CKK)     flattened conv weights
    # b_ref: (OC, 1)       bias (f32)
    # o_ref: (OC, P2p)     pooled + ReLU'd activations (lane-dense)
    y = jnp.dot(w_ref[...], p_ref[...], preferred_element_type=jnp.float32)
    # 2x2 max-pool == max over the 4 corner slabs (static 128-aligned slices).
    m = jnp.maximum(jnp.maximum(y[:, 0 * p2p:1 * p2p], y[:, 1 * p2p:2 * p2p]),
                    jnp.maximum(y[:, 2 * p2p:3 * p2p], y[:, 3 * p2p:4 * p2p]))
    # relu(max_j(conv_j) + b) == maxpool(relu(conv + b))  (bias shared, relu monotone)
    o_ref[...] = jnp.maximum(m + b_ref[...], 0.0)


def conv2d_relu_pool(x, w, b, *, compute_dtype=jnp.float32):
    """x: [N,C,H,W] f32, w: [OC,C,K,K], b: [OC]
    -> maxpool2x2(relu(valid conv(x))): [N, OC, OH//2, OW//2] f32."""
    N, C, H, W = x.shape
    OC, _, K, _ = w.shape
    OH, OW = H - K + 1, W - K + 1
    OH2, OW2 = OH // 2, OW // 2
    CKK = C * K * K
    P2 = OH2 * OW2
    P2p = _round_up(P2, 128)

    # im2col built directly in the kernel's (CKK, 4*P2p) layout (data movement
    # only, done once in XLA):
    #   slab[corner(dy,dx)][n, c*K*K + ky*K + kx, ph*OW2 + pw]
    #     = x[n, c, 2*ph + dy + ky, 2*pw + dx + kx]
    corner_slabs = []
    for dy in range(2):
        for dx in range(2):
            cols = []
            for ky in range(K):
                for kx in range(K):
                    ys, xs = dy + ky, dx + kx
                    cols.append(x[:, :, ys:ys + 2 * OH2:2, xs:xs + 2 * OW2:2])
            p = jnp.stack(cols, axis=2).reshape(N, CKK, P2)   # (c, ky, kx) order
            corner_slabs.append(jnp.pad(p, ((0, 0), (0, 0), (0, P2p - P2))))
    patches = jnp.concatenate(corner_slabs, axis=-1)          # [N, CKK, 4*P2p]
    patches = patches.astype(compute_dtype)

    wf = w.reshape(OC, CKK).astype(compute_dtype)             # matches patch ordering
    bf = b.reshape(OC, 1).astype(jnp.float32)

    flops = 2 * N * OC * CKK * 4 * P2p
    bytes_accessed = (patches.size * patches.dtype.itemsize
                      + wf.size * wf.dtype.itemsize
                      + bf.size * 4
                      + N * OC * P2p * 4)

    out = pl.pallas_call(
        functools.partial(conv_pool_kernel, p2p=P2p),
        out_shape=jax.ShapeDtypeStruct((N, OC, P2p), jnp.float32),
        grid=(N,),
        in_specs=[
            pl.BlockSpec((None, CKK, 4 * P2p), lambda n: (n, 0, 0)),
            pl.BlockSpec((OC, CKK), lambda n: (0, 0)),
            pl.BlockSpec((OC, 1), lambda n: (0, 0)),
        ],
        out_specs=pl.BlockSpec((None, OC, P2p), lambda n: (n, 0, 0)),
        compiler_params=pltpu.CompilerParams(dimension_semantics=("parallel",)),
        cost_estimate=pl.CostEstimate(flops=flops, transcendentals=0,
                                      bytes_accessed=bytes_accessed),
    )(patches, wf, bf)                                        # [N, OC, P2p]
    return out[:, :, :P2].reshape(N, OC, OH2, OW2)


# ------------------------- fused fc1 -> fc2 -> fc3 ---------------------------
def mlp_kernel(x_ref, w1_ref, b1_ref, w2_ref, b2_ref, w3_ref, b3_ref, o_ref,
               *, compute_dtype):
    h = jnp.dot(x_ref[...], w1_ref[...], preferred_element_type=jnp.float32) + b1_ref[...]
    h = jnp.maximum(h, 0.0).astype(compute_dtype)
    h = jnp.dot(h, w2_ref[...], preferred_element_type=jnp.float32) + b2_ref[...]
    h = jnp.maximum(h, 0.0).astype(compute_dtype)
    o_ref[...] = jnp.dot(h, w3_ref[...], preferred_element_type=jnp.float32) + b3_ref[...]


def mlp(x, fc_params, num_classes, *, compute_dtype=jnp.float32):
    """x: [N, F] f32.  fc weights stored as (in, out) so the kernel computes
    x @ W + b.  Layer widths are zero-padded to 128 lanes; logits sliced back."""
    (w1, b1), (w2, b2), (w3, b3) = fc_params
    N, F = x.shape

    def pad_fc(w, b, in_p, out_p):
        wi, wo = w.shape
        wp = jnp.pad(w, ((0, in_p - wi), (0, out_p - wo))).astype(compute_dtype)
        bp = jnp.pad(b, (0, out_p - wo)).reshape(1, out_p).astype(jnp.float32)
        return wp, bp

    h1 = _round_up(w1.shape[1], 128)   # 120 -> 128
    h2 = _round_up(w2.shape[1], 128)   # 84  -> 128
    h3 = _round_up(w3.shape[1], 128)   # 10  -> 128
    w1p, b1p = pad_fc(w1, b1, F, h1)
    w2p, b2p = pad_fc(w2, b2, h1, h2)
    w3p, b3p = pad_fc(w3, b3, h2, h3)
    xp = x.astype(compute_dtype)

    args = (xp, w1p, b1p, w2p, b2p, w3p, b3p)
    flops = 2 * N * (F * h1 + h1 * h2 + h2 * h3)
    bytes_accessed = sum(a.size * a.dtype.itemsize for a in args) + N * h3 * 4

    out = pl.pallas_call(
        functools.partial(mlp_kernel, compute_dtype=compute_dtype),
        out_shape=jax.ShapeDtypeStruct((N, h3), jnp.float32),
        grid=(1,),
        in_specs=[pl.BlockSpec(a.shape, lambda i: (0, 0)) for a in args],
        out_specs=pl.BlockSpec((N, h3), lambda i: (0, 0)),
        cost_estimate=pl.CostEstimate(flops=flops, transcendentals=0,
                                      bytes_accessed=bytes_accessed),
    )(*args)
    return out[:, :num_classes]


# --------------------------------- full model --------------------------------
def convnet_forward(x, params, *, compute_dtype=jnp.float32):
    num_classes = params["fc3"][0].shape[1]
    x = conv2d_relu_pool(x, *params["conv1"], compute_dtype=compute_dtype)  # [N,6,14,14]
    x = conv2d_relu_pool(x, *params["conv2"], compute_dtype=compute_dtype)  # [N,16,5,5]
    x = x.reshape(x.shape[0], -1)                      # == x.view(-1, 16*5*5): [N,400]
    return mlp(x, (params["fc1"], params["fc2"], params["fc3"]), num_classes,
               compute_dtype=compute_dtype)


# ---------------------- pure-JAX reference (correctness) ---------------------
def reference_forward(x, params):
    def conv(x, w, b):
        y = lax.conv_general_dilated(x, w, (1, 1), "VALID",
                                     dimension_numbers=("NCHW", "OIHW", "NCHW"))
        return jax.nn.relu(y + b.reshape(1, -1, 1, 1))

    def pool(x):
        return lax.reduce_window(x, -jnp.inf, lax.max, (1, 1, 2, 2), (1, 1, 2, 2), "VALID")

    x = pool(conv(x, *params["conv1"]))
    x = pool(conv(x, *params["conv2"]))
    x = x.reshape(x.shape[0], -1)
    w, b = params["fc1"]; x = jax.nn.relu(x @ w + b)
    w, b = params["fc2"]; x = jax.nn.relu(x @ w + b)
    w, b = params["fc3"]; x = x @ w + b
    return x


if __name__ == "__main__":
    key = jax.random.PRNGKey(0)
    ks = jax.random.split(key, 12)

    def unif(k, shape, fan_in):
        bound = 1.0 / float(np.sqrt(fan_in))
        return jax.random.uniform(k, shape, jnp.float32, -bound, bound)

    num_classes = 10  # len(CIFAR10 classes)
    params = {
        "conv1": (unif(ks[0], (6, 3, 5, 5), 3 * 25), unif(ks[1], (6,), 3 * 25)),
        "conv2": (unif(ks[2], (16, 6, 5, 5), 6 * 25), unif(ks[3], (16,), 6 * 25)),
        # stored pre-transposed (in, out) so the kernel computes x @ W + b
        "fc1": (unif(ks[4], (16 * 5 * 5, 120), 400), unif(ks[5], (120,), 400)),
        "fc2": (unif(ks[6], (120, 84), 120), unif(ks[7], (84,), 120)),
        "fc3": (unif(ks[8], (84, num_classes), 84), unif(ks[9], (num_classes,), 84)),
    }

    # CIFAR10-sized input: the 16*5*5 flatten requires 32x32 spatial.
    x = jax.random.normal(ks[10], (2, 3, 32, 32), jnp.float32)

    ref = reference_forward(x, params)

    # f32 path (exact): strict check against the reference.
    fwd_f32 = jax.jit(functools.partial(convnet_forward, compute_dtype=jnp.float32))
    out = fwd_f32(x, params)
    jax.block_until_ready(out)
    assert out.shape == (2, num_classes)
    np.testing.assert_allclose(np.asarray(out), np.asarray(ref), rtol=1e-4, atol=1e-4)

    # bf16 MXU-operand path (v6e/v7x recommendation): f32 accumulation, loose tolerance.
    fwd_bf16 = jax.jit(functools.partial(convnet_forward, compute_dtype=jnp.bfloat16))
    out_bf16 = fwd_bf16(x, params)
    jax.block_until_ready(out_bf16)
    np.testing.assert_allclose(np.asarray(out_bf16), np.asarray(ref), rtol=5e-2, atol=5e-2)

    print("KERNEL_OK")
</pallas_src>

<mosaic_0001>
module attributes {stable_mosaic.version = 11 : i64} {
  func.func @conv_pool_kernel(%arg0: i32, %arg1: memref<1x75x1024xf32, #tpu.memory_space<vmem>>, %arg2: memref<6x75xf32, #tpu.memory_space<vmem>>, %arg3: memref<6x1xf32, #tpu.memory_space<vmem>>, %arg4: memref<1x6x256xf32, #tpu.memory_space<vmem>>) attributes {dimension_semantics = [#tpu.dimension_semantics<parallel>], iteration_bounds = array<i64: 2>, scalar_prefetch = 0 : i64, scratch_operands = 0 : i64, tpu.core_type = #tpu.core_type<tc>, window_params = [{transform_indices = @transform_0, window_bounds = array<i64: 1, 75, 1024>}, {pipeline_mode = #tpu.pipeline_mode<synchronous>, transform_indices = @transform_1, window_bounds = array<i64: 6, 75>}, {pipeline_mode = #tpu.pipeline_mode<synchronous>, transform_indices = @transform_2, window_bounds = array<i64: 6, 1>}, {transform_indices = @transform_3, window_bounds = array<i64: 1, 6, 256>}]} {
    %c0 = arith.constant 0 : index
    %c0_0 = arith.constant 0 : index
    %0 = vector.load %arg2[%c0, %c0_0] : memref<6x75xf32, #tpu.memory_space<vmem>>, vector<6x75xf32>
    %c0_1 = arith.constant 0 : index
    %c0_2 = arith.constant 0 : index
    %c0_3 = arith.constant 0 : index
    %1 = vector.load %arg1[%c0_1, %c0_2, %c0_3] : memref<1x75x1024xf32, #tpu.memory_space<vmem>>, vector<1x75x1024xf32>
    %2 = vector.shape_cast %1 : vector<1x75x1024xf32> to vector<75x1024xf32>
    %cst = arith.constant dense<0.000000e+00> : vector<6x1024xf32>
    %3 = tpu.matmul %0, %2, %cst {dimension_numbers = #tpu.dot_dimension_numbers<[1], [0], [0], [1], [0, 0, 1, 1], [], []>} : vector<6x75xf32>, vector<75x1024xf32>, vector<6x1024xf32> -> vector<6x1024xf32>
    %4 = vector.extract_strided_slice %3 {offsets = [0, 0], sizes = [6, 256], strides = [1, 1]} : vector<6x1024xf32> to vector<6x256xf32>
    %5 = vector.extract_strided_slice %3 {offsets = [0, 256], sizes = [6, 256], strides = [1, 1]} : vector<6x1024xf32> to vector<6x256xf32>
    %6 = arith.maximumf %4, %5 : vector<6x256xf32>
    %7 = vector.extract_strided_slice %3 {offsets = [0, 512], sizes = [6, 256], strides = [1, 1]} : vector<6x1024xf32> to vector<6x256xf32>
    %8 = vector.extract_strided_slice %3 {offsets = [0, 768], sizes = [6, 256], strides = [1, 1]} : vector<6x1024xf32> to vector<6x256xf32>
    %9 = arith.maximumf %7, %8 : vector<6x256xf32>
    %10 = arith.maximumf %6, %9 : vector<6x256xf32>
    %c0_4 = arith.constant 0 : index
    %c0_5 = arith.constant 0 : index
    %11 = vector.load %arg3[%c0_4, %c0_5] : memref<6x1xf32, #tpu.memory_space<vmem>>, vector<6x1xf32>
    %12 = vector.broadcast %11 : vector<6x1xf32> to vector<6x256xf32>
    %13 = arith.addf %10, %12 : vector<6x256xf32>
    %cst_6 = arith.constant 0.000000e+00 : f32
    %14 = vector.broadcast %cst_6 : f32 to vector<6x256xf32>
    %15 = arith.maximumf %13, %14 : vector<6x256xf32>
    %c0_7 = arith.constant 0 : index
    %c0_8 = arith.constant 0 : index
    %c0_9 = arith.constant 0 : index
    %16 = vector.load %arg4[%c0_7, %c0_8, %c0_9] : memref<1x6x256xf32, #tpu.memory_space<vmem>>, vector<1x6x256xf32>
    %17 = vector.shape_cast %16 : vector<1x6x256xf32> to vector<6x256xf32>
    %18 = vector.shape_cast %15 : vector<6x256xf32> to vector<1x6x256xf32>
    tpu.vector_store %arg4[%c0_7, %c0_8, %c0_9], %18 {strides = array<i32>} : memref<1x6x256xf32, #tpu.memory_space<vmem>>, vector<1x6x256xf32>,
    return
  }
  func.func @transform_0(%arg0: i32) -> (i32, i32, i32) {
    %c0_i32 = arith.constant 0 : i32
    %c0_i32_0 = arith.constant 0 : i32
    %c0_i32_1 = arith.constant 0 : i32
    return %arg0, %c0_i32, %c0_i32_0 : i32, i32, i32
  }
  func.func @transform_1(%arg0: i32) -> (i32, i32) {
    %c0_i32 = arith.constant 0 : i32
    %c0_i32_0 = arith.constant 0 : i32
    %c0_i32_1 = arith.constant 0 : i32
    return %c0_i32, %c0_i32_0 : i32, i32
  }
  func.func @transform_2(%arg0: i32) -> (i32, i32) {
    %c0_i32 = arith.constant 0 : i32
    %c0_i32_0 = arith.constant 0 : i32
    %c0_i32_1 = arith.constant 0 : i32
    return %c0_i32, %c0_i32_0 : i32, i32
  }
  func.func @transform_3(%arg0: i32) -> (i32, i32, i32) {
    %c0_i32 = arith.constant 0 : i32
    %c0_i32_0 = arith.constant 0 : i32
    %c0_i32_1 = arith.constant 0 : i32
    return %arg0, %c0_i32, %c0_i32_0 : i32, i32, i32
  }
}

module attributes {stable_mosaic.version = 11 : i64} {
  func.func @conv_pool_kernel(%arg0: i32, %arg1: memref<1x150x512xf32, #tpu.memory_space<vmem>>, %arg2: memref<16x150xf32, #tpu.memory_space<vmem>>, %arg3: memref<16x1xf32, #tpu.memory_space<vmem>>, %arg4: memref<1x16x128xf32, #tpu.memory_space<vmem>>) attributes {dimension_semantics = [#tpu.dimension_semantics<parallel>], iteration_bounds = array<i64: 2>, scalar_prefetch = 0 : i64, scratch_operands = 0 : i64, tpu.core_type = #tpu.core_type<tc>, window_params = [{transform_indices = @transform_0, window_bounds = array<i64: 1, 150, 512>}, {pipeline_mode = #tpu.pipeline_mode<synchronous>, transform_indices = @transform_1, window_bounds = array<i64: 16, 150>}, {pipeline_mode = #tpu.pipeline_mode<synchronous>, transform_indices = @transform_2, window_bounds = array<i64: 16, 1>}, {transform_indices = @transform_3, window_bounds = array<i64: 1, 16, 128>}]} {
    %c0 = arith.constant 0 : index
    %c0_0 = arith.constant 0 : index
    %0 = vector.load %arg2[%c0, %c0_0] : memref<16x150xf32, #tpu.memory_space<vmem>>, vector<16x150xf32>
    %c0_1 = arith.constant 0 : index
    %c0_2 = arith.constant 0 : index
    %c0_3 = arith.constant 0 : index
    %1 = vector.load %arg1[%c0_1, %c0_2, %c0_3] : memref<1x150x512xf32, #tpu.memory_space<vmem>>, vector<1x150x512xf32>
    %2 = vector.shape_cast %1 : vector<1x150x512xf32> to vector<150x512xf32>
    %cst = arith.constant dense<0.000000e+00> : vector<16x512xf32>
    %3 = tpu.matmul %0, %2, %cst {dimension_numbers = #tpu.dot_dimension_numbers<[1], [0], [0], [1], [0, 0, 1, 1], [], []>} : vector<16x150xf32>, vector<150x512xf32>, vector<16x512xf32> -> vector<16x512xf32>
    %4 = vector.extract_strided_slice %3 {offsets = [0, 0], sizes = [16, 128], strides = [1, 1]} : vector<16x512xf32> to vector<16x128xf32>
    %5 = vector.extract_strided_slice %3 {offsets = [0, 128], sizes = [16, 128], strides = [1, 1]} : vector<16x512xf32> to vector<16x128xf32>
    %6 = arith.maximumf %4, %5 : vector<16x128xf32>
    %7 = vector.extract_strided_slice %3 {offsets = [0, 256], sizes = [16, 128], strides = [1, 1]} : vector<16x512xf32> to vector<16x128xf32>
    %8 = vector.extract_strided_slice %3 {offsets = [0, 384], sizes = [16, 128], strides = [1, 1]} : vector<16x512xf32> to vector<16x128xf32>
    %9 = arith.maximumf %7, %8 : vector<16x128xf32>
    %10 = arith.maximumf %6, %9 : vector<16x128xf32>
    %c0_4 = arith.constant 0 : index
    %c0_5 = arith.constant 0 : index
    %11 = vector.load %arg3[%c0_4, %c0_5] : memref<16x1xf32, #tpu.memory_space<vmem>>, vector<16x1xf32>
    %12 = vector.broadcast %11 : vector<16x1xf32> to vector<16x128xf32>
    %13 = arith.addf %10, %12 : vector<16x128xf32>
    %cst_6 = arith.constant 0.000000e+00 : f32
    %14 = vector.broadcast %cst_6 : f32 to vector<16x128xf32>
    %15 = arith.maximumf %13, %14 : vector<16x128xf32>
    %c0_7 = arith.constant 0 : index
    %c0_8 = arith.constant 0 : index
    %c0_9 = arith.constant 0 : index
    %16 = vector.load %arg4[%c0_7, %c0_8, %c0_9] : memref<1x16x128xf32, #tpu.memory_space<vmem>>, vector<1x16x128xf32>
    %17 = vector.shape_cast %16 : vector<1x16x128xf32> to vector<16x128xf32>
    %18 = vector.shape_cast %15 : vector<16x128xf32> to vector<1x16x128xf32>
    tpu.vector_store %arg4[%c0_7, %c0_8, %c0_9], %18 {strides = array<i32>} : memref<1x16x128xf32, #tpu.memory_space<vmem>>, vector<1x16x128xf32>,
    return
  }
  func.func @transform_0(%arg0: i32) -> (i32, i32, i32) {
    %c0_i32 = arith.constant 0 : i32
    %c0_i32_0 = arith.constant 0 : i32
    %c0_i32_1 = arith.constant 0 : i32
    return %arg0, %c0_i32, %c0_i32_0 : i32, i32, i32
  }
  func.func @transform_1(%arg0: i32) -> (i32, i32) {
    %c0_i32 = arith.constant 0 : i32
    %c0_i32_0 = arith.constant 0 : i32
    %c0_i32_1 = arith.constant 0 : i32
    return %c0_i32, %c0_i32_0 : i32, i32
  }
  func.func @transform_2(%arg0: i32) -> (i32, i32) {
    %c0_i32 = arith.constant 0 : i32
    %c0_i32_0 = arith.constant 0 : i32
    %c0_i32_1 = arith.constant 0 : i32
    return %c0_i32, %c0_i32_0 : i32, i32
  }
  func.func @transform_3(%arg0: i32) -> (i32, i32, i32) {
    %c0_i32 = arith.constant 0 : i32
    %c0_i32_0 = arith.constant 0 : i32
    %c0_i32_1 = arith.constant 0 : i32
    return %arg0, %c0_i32, %c0_i32_0 : i32, i32, i32
  }
}

module attributes {stable_mosaic.version = 11 : i64} {
  func.func @mlp_kernel(%arg0: i32, %arg1: memref<2x400xf32, #tpu.memory_space<vmem>>, %arg2: memref<400x128xf32, #tpu.memory_space<vmem>>, %arg3: memref<1x128xf32, #tpu.memory_space<vmem>>, %arg4: memref<128x128xf32, #tpu.memory_space<vmem>>, %arg5: memref<1x128xf32, #tpu.memory_space<vmem>>, %arg6: memref<128x128xf32, #tpu.memory_space<vmem>>, %arg7: memref<1x128xf32, #tpu.memory_space<vmem>>, %arg8: memref<2x128xf32, #tpu.memory_space<vmem>>) attributes {dimension_semantics = [#tpu.dimension_semantics<arbitrary>], iteration_bounds = array<i64: 1>, scalar_prefetch = 0 : i64, scratch_operands = 0 : i64, tpu.core_type = #tpu.core_type<tc>, window_params = [{pipeline_mode = #tpu.pipeline_mode<synchronous>, transform_indices = @transform_0, window_bounds = array<i64: 2, 400>}, {pipeline_mode = #tpu.pipeline_mode<synchronous>, transform_indices = @transform_1, window_bounds = array<i64: 400, 128>}, {pipeline_mode = #tpu.pipeline_mode<synchronous>, transform_indices = @transform_2, window_bounds = array<i64: 1, 128>}, {pipeline_mode = #tpu.pipeline_mode<synchronous>, transform_indices = @transform_3, window_bounds = array<i64: 128, 128>}, {pipeline_mode = #tpu.pipeline_mode<synchronous>, transform_indices = @transform_4, window_bounds = array<i64: 1, 128>}, {pipeline_mode = #tpu.pipeline_mode<synchronous>, transform_indices = @transform_5, window_bounds = array<i64: 128, 128>}, {pipeline_mode = #tpu.pipeline_mode<synchronous>, transform_indices = @transform_6, window_bounds = array<i64: 1, 128>}, {pipeline_mode = #tpu.pipeline_mode<synchronous>, transform_indices = @transform_7, window_bounds = array<i64: 2, 128>}]} {
    %c0 = arith.constant 0 : index
    %c0_0 = arith.constant 0 : index
    %0 = vector.load %arg1[%c0, %c0_0] : memref<2x400xf32, #tpu.memory_space<vmem>>, vector<2x400xf32>
    %c0_1 = arith.constant 0 : index
    %c0_2 = arith.constant 0 : index
    %1 = vector.load %arg2[%c0_1, %c0_2] : memref<400x128xf32, #tpu.memory_space<vmem>>, vector<400x128xf32>
    %cst = arith.constant dense<0.000000e+00> : vector<2x128xf32>
    %2 = tpu.matmul %0, %1, %cst {dimension_numbers = #tpu.dot_dimension_numbers<[1], [0], [0], [1], [0, 0, 1, 1], [], []>} : vector<2x400xf32>, vector<400x128xf32>, vector<2x128xf32> -> vector<2x128xf32>
    %c0_3 = arith.constant 0 : index
    %c0_4 = arith.constant 0 : index
    %3 = vector.load %arg3[%c0_3, %c0_4] : memref<1x128xf32, #tpu.memory_space<vmem>>, vector<1x128xf32>
    %4 = vector.broadcast %3 : vector<1x128xf32> to vector<2x128xf32>
    %5 = arith.addf %2, %4 : vector<2x128xf32>
    %cst_5 = arith.constant 0.000000e+00 : f32
    %6 = vector.broadcast %cst_5 : f32 to vector<2x128xf32>
    %7 = arith.maximumf %5, %6 : vector<2x128xf32>
    %c0_6 = arith.constant 0 : index
    %c0_7 = arith.constant 0 : index
    %8 = vector.load %arg4[%c0_6, %c0_7] : memref<128x128xf32, #tpu.memory_space<vmem>>, vector<128x128xf32>
    %cst_8 = arith.constant dense<0.000000e+00> : vector<2x128xf32>
    %9 = tpu.matmul %7, %8, %cst_8 {dimension_numbers = #tpu.dot_dimension_numbers<[1], [0], [0], [1], [0, 0, 1, 1], [], []>} : vector<2x128xf32>, vector<128x128xf32>, vector<2x128xf32> -> vector<2x128xf32>
    %c0_9 = arith.constant 0 : index
    %c0_10 = arith.constant 0 : index
    %10 = vector.load %arg5[%c0_9, %c0_10] : memref<1x128xf32, #tpu.memory_space<vmem>>, vector<1x128xf32>
    %11 = vector.broadcast %10 : vector<1x128xf32> to vector<2x128xf32>
    %12 = arith.addf %9, %11 : vector<2x128xf32>
    %cst_11 = arith.constant 0.000000e+00 : f32
    %13 = vector.broadcast %cst_11 : f32 to vector<2x128xf32>
    %14 = arith.maximumf %12, %13 : vector<2x128xf32>
    %c0_12 = arith.constant 0 : index
    %c0_13 = arith.constant 0 : index
    %15 = vector.load %arg6[%c0_12, %c0_13] : memref<128x128xf32, #tpu.memory_space<vmem>>, vector<128x128xf32>
    %cst_14 = arith.constant dense<0.000000e+00> : vector<2x128xf32>
    %16 = tpu.matmul %14, %15, %cst_14 {dimension_numbers = #tpu.dot_dimension_numbers<[1], [0], [0], [1], [0, 0, 1, 1], [], []>} : vector<2x128xf32>, vector<128x128xf32>, vector<2x128xf32> -> vector<2x128xf32>
    %c0_15 = arith.constant 0 : index
    %c0_16 = arith.constant 0 : index
    %17 = vector.load %arg7[%c0_15, %c0_16] : memref<1x128xf32, #tpu.memory_space<vmem>>, vector<1x128xf32>
    %18 = vector.broadcast %17 : vector<1x128xf32> to vector<2x128xf32>
    %19 = arith.addf %16, %18 : vector<2x128xf32>
    %c0_17 = arith.constant 0 : index
    %c0_18 = arith.constant 0 : index
    %20 = vector.load %arg8[%c0_17, %c0_18] : memref<2x128xf32, #tpu.memory_space<vmem>>, vector<2x128xf32>
    tpu.vector_store %arg8[%c0_17, %c0_18], %19 {strides = array<i32>} : memref<2x128xf32, #tpu.memory_space<vmem>>, vector<2x128xf32>,
    return
  }
  func.func @transform_0(%arg0: i32) -> (i32, i32) {
    %c0_i32 = arith.constant 0 : i32
    %c0_i32_0 = arith.constant 0 : i32
    %c0_i32_1 = arith.constant 0 : i32
    return %c0_i32, %c0_i32_0 : i32, i32
  }
  func.func @transform_1(%arg0: i32) -> (i32, i32) {
    %c0_i32 = arith.constant 0 : i32
    %c0_i32_0 = arith.constant 0 : i32
    %c0_i32_1 = arith.constant 0 : i32
    return %c0_i32, %c0_i32_0 : i32, i32
  }
  func.func @transform_2(%arg0: i32) -> (i32, i32) {
    %c0_i32 = arith.constant 0 : i32
    %c0_i32_0 = arith.constant 0 : i32
    %c0_i32_1 = arith.constant 0 : i32
    return %c0_i32, %c0_i32_0 : i32, i32
  }
  func.func @transform_3(%arg0: i32) -> (i32, i32) {
    %c0_i32 = arith.constant 0 : i32
    %c0_i32_0 = arith.constant 0 : i32
    %c0_i32_1 = arith.constant 0 : i32
    return %c0_i32, %c0_i32_0 : i32, i32
  }
  func.func @transform_4(%arg0: i32) -> (i32, i32) {
    %c0_i32 = arith.constant 0 : i32
    %c0_i32_0 = arith.constant 0 : i32
    %c0_i32_1 = arith.constant 0 : i32
    return %c0_i32, %c0_i32_0 : i32, i32
  }
  func.func @transform_5(%arg0: i32) -> (i32, i32) {
    %c0_i32 = arith.constant 0 : i32
    %c0_i32_0 = arith.constant 0 : i32
    %c0_i32_1 = arith.constant 0 : i32
    return %c0_i32, %c0_i32_0 : i32, i32
  }
  func.func @transform_6(%arg0: i32) -> (i32, i32) {
    %c0_i32 = arith.constant 0 : i32
    %c0_i32_0 = arith.constant 0 : i32
    %c0_i32_1 = arith.constant 0 : i32
    return %c0_i32, %c0_i32_0 : i32, i32
  }
  func.func @transform_7(%arg0: i32) -> (i32, i32) {
    %c0_i32 = arith.constant 0 : i32
    %c0_i32_0 = arith.constant 0 : i32
    %c0_i32_1 = arith.constant 0 : i32
    return %c0_i32, %c0_i32_0 : i32, i32
  }
}

</mosaic_0001>

<bundles_post_ra>
// kernel: convnet_forward.3
= control target key start
LH: loop header
LB: loop body
LE: loop exit
PB: predicated region body
PF: predicated region fallthrough
CT: control target
= control target key end

     0   :  { %s793_s12 = smov 0   ;;  %s936_s0 = inlined_call_operand.vmem [shape: f32[2,75,1024], index: 0, kind: input, shape index: {}]   ;;  %s937_s1 = inlined_call_operand.vmem [shape: f32[6,75], index: 1, kind: input, shape index: {}]   ;;  %s938_s2 = inlined_call_operand.vmem [shape: f32[6,1], index: 2, kind: input, shape index: {}]   ;;  %s939_s3 = inlined_call_operand.vmem [shape: f32[2,6,256], index: 3, kind: output, shape index: {}]  }
   0x1 LB: > { %s638_s13 = sadd.s32 4294967295, %s768_s12   ;;  %p642_p0 = scmp.ge.s32.totalorder %s768_s12, 1  ;;  %s768_s12 = sphi %s793_s12, %s13_s12  }
   0x2   : > { %p137_p1 = scmp.lt.s32.totalorder %s768_s12, 3 }
   0x4   : > { %p138_p2 = pnand %p642_p0, %p137_p1 }
   0x5   : > { %p161_p3 = scmp.lt.s32.totalorder (!%p138_p2), %s638_s13, 1  ;;  %v770_v0 = vmov (!%p138_p2), 0.0   ;;  %v571_v1 = vld [vmem:[%s938_s2] sm:$0x3f] (!%p138_p2)  ;;  %v771_v2 = vmov (!%p138_p2), 0   ;;  %vm256_vm0 = vcmask (!%p138_p2), 1042432  }
   0x6   : > { %141 = sbr.rel (%p138_p2) target bundleno = 284 (0x11c), region = 32  ;;  %345 = vmatprep.mubr.f32.mxu0 (!%p138_p2), %v770_v0  ;;  %416 = vmatprep.mubr.f32.mxu1 (!%p138_p2), %v770_v0  ;;  %vm772_vm1 = vmmov (!%p138_p2), 1   ;;  %vm252_vm3 = vcmask (!%p138_p2), 613376  }
   0x7   : > { %761 = vset.pattern.permute.xlu0 (!%p138_p2), %v771_v2  ;;  %vm850_vm2 = vmpackc.low (!%p138_p2), %vm256_vm0, %vm772_vm1 }
   0x8   : > { %574 = vperm.xlu0 (!%p138_p2), %761, %v571_v1  }
   0xd   : > { %s943_s13 = smov (!%p161_p3, %s638_s13), 1 }
   0xe   : > { %s749_s16 = smul.u32 640, %s943_s13  ;;  %s660_s22 = sshll.u32 %s943_s13, 4 }
   0xf   : > { %s170_s25 = scalar_lea.vmem %s939_s3, %s660_s22 }
  0x10   : > { %s812_s19 = scalar_lea.vmem %s936_s0, %s749_s16 }
  0x11   : > { %v173_v3 = vld [vmem:[%s812_s19 + $0x8] sm:$0xff]  ;;  %v175_v5 = vld [vmem:[%s812_s19 + $0x18] sm:$0xff]  ;;  %v172_v8 = vld [vmem:[%s812_s19] sm:$0xff] }
  0x12   : > { %v181_v4 = vld [vmem:[%s812_s19 + $0x48] sm:$0xff]  ;;  %v183_v7 = vld [vmem:[%s812_s19 + $0x58] sm:$0xff]  ;;  %v180_v9 = vld [vmem:[%s812_s19 + $0x40] sm:$0xff] }
  0x13   : > { %v661_v6 = vpack.c.bf16 %v181_v4, %v173_v3  ;;  %v683_v10 = vpack.c.bf16 %v183_v7, %v175_v5  ;;  %v663_v11 = vpack.c.bf16 %v180_v9, %v172_v8  ;;  %v174_v12 = vld [vmem:[%s812_s19 + $0x10] sm:$0xff]  ;;  %v189_v14 = vld [vmem:[%s812_s19 + $0x88] sm:$0xff]  ;;  %v191_v17 = vld [vmem:[%s812_s19 + $0x98] sm:$0xff] }
  0x14   : > { %v182_v13 = vld [vmem:[%s812_s19 + $0x50] sm:$0xff]  ;;  %v197_v16 = vld [vmem:[%s812_s19 + $0xc8] sm:$0xff]  ;;  %v199_v18 = vld [vmem:[%s812_s19 + $0xd8] sm:$0xff] }
  0x15   : > { %662 = vmatprep.subr.bf16.mxu0 %v661_v6  ;;  %v685_v15 = vpack.c.bf16 %v182_v13, %v174_v12  ;;  %684 = vmatprep.subr.bf16.mxu1 %v683_v10  ;;  %v665_v19 = vpack.c.bf16 %v197_v16, %v189_v14  ;;  %v687_v20 = vpack.c.bf16 %v199_v18, %v191_v17  ;;  %v188_v21 = vld [vmem:[%s812_s19 + $0x80] sm:$0xff]  ;;  %v190_v23 = vld [vmem:[%s812_s19 + $0x90] sm:$0xff]  ;;  %v205_v26 = vld [vmem:[%s812_s19 + $0x108] sm:$0xff] }
  0x16   : > { %664 = vmatpush1.bf16.msra.mxu0 %v663_v11  ;;  %v196_v22 = vld [vmem:[%s812_s19 + $0xc0] sm:$0xff]  ;;  %v198_v25 = vld [vmem:[%s812_s19 + $0xd0] sm:$0xff]  ;;  %v213_v27 = vld [vmem:[%s812_s19 + $0x148] sm:$0xff] }
  0x17   : > { %686 = vmatpush1.bf16.msra.mxu1 %v685_v15  ;;  %v667_v24 = vpack.c.bf16 %v196_v22, %v188_v21  ;;  %666 = vmatprep.subr.bf16.mxu0 %v665_v19  ;;  %v689_v28 = vpack.c.bf16 %v198_v25, %v190_v23  ;;  %v669_v29 = vpack.c.bf16 %v213_v27, %v205_v26  ;;  %v207_v30 = vld [vmem:[%s812_s19 + $0x118] sm:$0xff]  ;;  %v204_v32 = vld [vmem:[%s812_s19 + $0x100] sm:$0xff]  ;;  %v206_v35 = vld [vmem:[%s812_s19 + $0x110] sm:$0xff] }
  0x18   : > { %688 = vmatprep.subr.bf16.mxu1 %v687_v20  ;;  %v215_v31 = vld [vmem:[%s812_s19 + $0x158] sm:$0xff]  ;;  %v212_v34 = vld [vmem:[%s812_s19 + $0x140] sm:$0xff]  ;;  %v214_v36 = vld [vmem:[%s812_s19 + $0x150] sm:$0xff] }
  0x19   : > { %v691_v33 = vpack.c.bf16 %v215_v31, %v207_v30  ;;  %v671_v37 = vpack.c.bf16 %v212_v34, %v204_v32  ;;  %v221_v38 = vld [vmem:[%s812_s19 + $0x188] sm:$0xff]  ;;  %v223_v40 = vld [vmem:[%s812_s19 + $0x198] sm:$0xff]  ;;  %v693_v41 = vpack.c.bf16 %v214_v36, %v206_v35  ;;  %v220_v44 = vld [vmem:[%s812_s19 + $0x180] sm:$0xff] }
  0x1a   : > { %668 = vmatpush1.bf16.msra.mxu0 %v667_v24  ;;  %v229_v39 = vld [vmem:[%s812_s19 + $0x1c8] sm:$0xff]  ;;  %v231_v43 = vld [vmem:[%s812_s19 + $0x1d8] sm:$0xff]  ;;  %v228_v45 = vld [vmem:[%s812_s19 + $0x1c0] sm:$0xff] }
  0x1b   : > { %690 = vmatpush1.bf16.msra.mxu1 %v689_v28  ;;  %670 = vmatprep.subr.bf16.mxu0 %v669_v29  ;;  %v673_v42 = vpack.c.bf16 %v229_v39, %v221_v38  ;;  %v695_v46 = vpack.c.bf16 %v231_v43, %v223_v40  ;;  %v222_v47 = vld [vmem:[%s812_s19 + $0x190] sm:$0xff]  ;;  %v237_v49 = vld [vmem:[%s812_s19 + $0x208] sm:$0xff]  ;;  %v239_v51 = vld [vmem:[%s812_s19 + $0x218] sm:$0xff]  ;;  %v675_v53 = vpack.c.bf16 %v228_v45, %v220_v44 }
  0x1c   : > { %692 = vmatprep.subr.bf16.mxu1 %v691_v33  ;;  %v230_v48 = vld [vmem:[%s812_s19 + $0x1d0] sm:$0xff]  ;;  %v245_v50 = vld [vmem:[%s812_s19 + $0x248] sm:$0x7]  ;;  %v247_v52 = vld [vmem:[%s812_s19 + $0x258] sm:$0x7] }
  0x1d   : > { %v697_v55 = vpack.c.bf16 %v230_v48, %v222_v47  ;;  %v677_v56 = vpack.c.bf16 %v245_v50, %v237_v49  ;;  %v236_v57 = vld [vmem:[%s812_s19 + $0x200] sm:$0xff]  ;;  %v238_v59 = vld [vmem:[%s812_s19 + $0x210] sm:$0xff]  ;;  %v699_v60 = vpack.c.bf16 %v247_v52, %v239_v51  ;;  %v177_v62 = vld [vmem:[%s812_s19 + $0x28] sm:$0xff] }
  0x1e   : > { %672 = vmatpush1.bf16.msra.mxu0 %v671_v37  ;;  %v244_v58 = vld [vmem:[%s812_s19 + $0x240] sm:$0x7]  ;;  %v246_v61 = vld [vmem:[%s812_s19 + $0x250] sm:$0x7]  ;;  %v185_v63 = vld [vmem:[%s812_s19 + $0x68] sm:$0xff] }
  0x1f   : > { %694 = vmatpush1.bf16.msra.mxu1 %v693_v41  ;;  %674 = vmatprep.subr.bf16.mxu0 %v673_v42  ;;  %v179_v1 = vld [vmem:[%s812_s19 + $0x38] sm:$0xff]  ;;  %v680_v3 = vpack.c.bf16 %v244_v58, %v236_v57  ;;  %v702_v4 = vpack.c.bf16 %v246_v61, %v238_v59  ;;  %v705_v5 = vpack.c.bf16 %v185_v63, %v177_v62  ;;  %v176_v6 = vld [vmem:[%s812_s19 + $0x20] sm:$0xff]  ;;  %v178_v8 = vld [vmem:[%s812_s19 + $0x30] sm:$0xff] }
  0x20   : > { %696 = vmatprep.subr.bf16.mxu1 %v695_v46  ;;  %v187_v2 = vld [vmem:[%s812_s19 + $0x78] sm:$0xff]  ;;  %v184_v7 = vld [vmem:[%s812_s19 + $0x60] sm:$0xff]  ;;  %v186_v10 = vld [vmem:[%s812_s19 + $0x70] sm:$0xff] }
  0x21   : > { %v727_v9 = vpack.c.bf16 %v187_v2, %v179_v1  ;;  %v193_v11 = vld [vmem:[%s812_s19 + $0xa8] sm:$0xff]  ;;  %v195_v13 = vld [vmem:[%s812_s19 + $0xb8] sm:$0xff]  ;;  %v879_v15 = vld [vmem:[%s937_s1] sm:$0x3f]  ;;  %v707_v16 = vpack.c.bf16 %v184_v7, %v176_v6  ;;  %v729_v17 = vpack.c.bf16 %v186_v10, %v178_v8 }
  0x22   : > { %676 = vmatpush1.bf16.msra.mxu0 %v675_v53  ;;  %v201_v12 = vld [vmem:[%s812_s19 + $0xe8] sm:$0xff]  ;;  %v203_v14 = vld [vmem:[%s812_s19 + $0xf8] sm:$0xff]  ;;  %v192_v19 = vld [vmem:[%s812_s19 + $0xa0] sm:$0xff] }
  0x23   : > { %698 = vmatpush1.bf16.msra.mxu1 %v697_v55  ;;  %679 = vmatprep.subr.msk.bf16.mxu0 %vm850_vm2, %v677_v56  ;;  %v709_v18 = vpack.c.bf16 %v201_v12, %v193_v11  ;;  %v200_v20 = vld [vmem:[%s812_s19 + $0xe0] sm:$0xff]  ;;  %v194_v21 = vld [vmem:[%s812_s19 + $0xb0] sm:$0xff]  ;;  %v731_v22 = vpack.c.bf16 %v203_v14, %v195_v13  ;;  %v209_v24 = vld [vmem:[%s812_s19 + $0x128] sm:$0xff] }
  0x24   : > { %701 = vmatprep.subr.msk.bf16.mxu1 %vm850_vm2, %v699_v60  ;;  %v202_v23 = vld [vmem:[%s812_s19 + $0xf0] sm:$0xff]  ;;  %v217_v25 = vld [vmem:[%s812_s19 + $0x168] sm:$0xff]  ;;  %v211_v26 = vld [vmem:[%s812_s19 + $0x138] sm:$0xff]  ;;  %v711_v28 = vpack.c.bf16 %v200_v20, %v192_v19 }
  0x25   : > { %v219_v27 = vld [vmem:[%s812_s19 + $0x178] sm:$0xff]  ;;  %v733_v29 = vpack.c.bf16 %v202_v23, %v194_v21  ;;  %v713_v30 = vpack.c.bf16 %v217_v25, %v209_v24  ;;  %v208_v31 = vld [vmem:[%s812_s19 + $0x120] sm:$0xff]  ;;  %v210_v33 = vld [vmem:[%s812_s19 + $0x130] sm:$0xff] }
  0x26   : > { %682 = vmatpush1.bf16.msk.msra.mxu0 %vm850_vm2, %v680_v3  ;;  %v216_v32 = vld [vmem:[%s812_s19 + $0x160] sm:$0xff]  ;;  %v735_v34 = vpack.c.bf16 %v219_v27, %v211_v26  ;;  %v218_v35 = vld [vmem:[%s812_s19 + $0x170] sm:$0xff]  ;;  %v225_v36 = vld [vmem:[%s812_s19 + $0x1a8] sm:$0xff] }
  0x27   : > { %704 = vmatpush1.bf16.msk.msra.mxu1 %vm850_vm2, %v702_v4  ;;  %706 = vmatprep.subr.bf16.mxu0 %v705_v5  ;;  %v233_v37 = vld [vmem:[%s812_s19 + $0x1e8] sm:$0xff]  ;;  %v227_v38 = vld [vmem:[%s812_s19 + $0x1b8] sm:$0xff]  ;;  %v715_v40 = vpack.c.bf16 %v216_v32, %v208_v31  ;;  %v737_v41 = vpack.c.bf16 %v218_v35, %v210_v33  ;;  %v224_v43 = vld [vmem:[%s812_s19 + $0x1a0] sm:$0xff] }
  0x28   : > { %728 = vmatprep.subr.bf16.mxu1 %v727_v9  ;;  %v235_v39 = vld [vmem:[%s812_s19 + $0x1f8] sm:$0xff]  ;;  %v717_v42 = vpack.c.bf16 %v233_v37, %v225_v36  ;;  %v232_v44 = vld [vmem:[%s812_s19 + $0x1e0] sm:$0xff]  ;;  %v226_v45 = vld [vmem:[%s812_s19 + $0x1b0] sm:$0xff] }
  0x29   : > { %648 = vmatmul.mubr.msk.f32.vlgmr.msra.gmra.mrb[0].mxu0 %vm252_vm3, %v879_v15  ;;  %v739_v46 = vpack.c.bf16 %v235_v39, %v227_v38  ;;  %v234_v47 = vld [vmem:[%s812_s19 + $0x1f0] sm:$0xff]  ;;  %v241_v48 = vld [vmem:[%s812_s19 + $0x228] sm:$0xff]  ;;  %v251_v50 = vld [vmem:[%s812_s19 + $0x278] sm:$0x7]  ;;  %v719_v51 = vpack.c.bf16 %v232_v44, %v224_v43 }
  0x2a   : > { %651 = vmatmul.mubr.msk.f32.vlgmr.msra.gmra.mrb[0].mxu1 %vm252_vm3, %v879_v15  ;;  %708 = vmatpush1.bf16.msra.mxu0 %v707_v16  ;;  %v249_v49 = vld [vmem:[%s812_s19 + $0x268] sm:$0x7]  ;;  %v741_v52 = vpack.c.bf16 %v234_v47, %v226_v45  ;;  %v240_v55 = vld [vmem:[%s812_s19 + $0x220] sm:$0xff]  ;;  %v242_v58 = vld [vmem:[%s812_s19 + $0x230] sm:$0xff] }
  0x2b   : > { %730 = vmatpush1.bf16.msra.mxu1 %v729_v17  ;;  %710 = vmatprep.subr.bf16.mxu0 %v709_v18  ;;  %v721_v53 = vpack.c.bf16 %v249_v49, %v241_v48  ;;  %v248_v56 = vld [vmem:[%s812_s19 + $0x260] sm:$0x7]  ;;  %v250_v59 = vld [vmem:[%s812_s19 + $0x270] sm:$0x7] }
  0x2c   : > { %732 = vmatprep.subr.bf16.mxu1 %v731_v22  ;;  %487 = vmatprep.mubr.f32.mxu0 %v770_v0  ;;  %v724_v60 = vpack.c.bf16 %v248_v56, %v240_v55  ;;  %v746_v61 = vpack.c.bf16 %v250_v59, %v242_v58 }
  0x2d   : > { %558 = vmatprep.mubr.f32.mxu1 %v770_v0  ;;  %v243_v0 = vld [vmem:[%s812_s19 + $0x238] sm:$0xff] }
  0x2e   : > { %712 = vmatpush1.bf16.msra.mxu0 %v711_v28  ;;  %v743_v57 = vpack.c.bf16 %v251_v50, %v243_v0 }
  0x2f   : > { %734 = vmatpush1.bf16.msra.mxu1 %v733_v29  ;;  %714 = vmatprep.subr.bf16.mxu0 %v713_v30 }
  0x30   : > { %736 = vmatprep.subr.bf16.mxu1 %v735_v34 }
  0x32   : > { %716 = vmatpush1.bf16.msra.mxu0 %v715_v40 }
  0x33   : > { %738 = vmatpush1.bf16.msra.mxu1 %v737_v41  ;;  %718 = vmatprep.subr.bf16.mxu0 %v717_v42 }
  0x34   : > { %740 = vmatprep.subr.bf16.mxu1 %v739_v46 }
  0x36   : > { %720 = vmatpush1.bf16.msra.mxu0 %v719_v51 }
  0x37   : > { %742 = vmatpush1.bf16.msra.mxu1 %v741_v52  ;;  %723 = vmatprep.subr.msk.bf16.mxu0 %vm850_vm2, %v721_v53 }
  0x38   : > { %745 = vmatprep.subr.msk.bf16.mxu1 %vm850_vm2, %v743_v57 }
  0x3a   : > { %726 = vmatpush1.bf16.msk.msra.mxu0 %vm850_vm2, %v724_v60 }
  0x3b   : > { %748 = vmatpush1.bf16.msk.msra.mxu1 %vm850_vm2, %v746_v61 }
  0x3d   : > { %654 = vmatmul.mubr.msk.f32.vlgmr.msra.gmra.mrb[2].mxu0 %vm252_vm3, %v879_v15 }
  0x3e   : > { %657 = vmatmul.mubr.msk.f32.vlgmr.msra.gmra.mrb[2].mxu1 %vm252_vm3, %v879_v15 }
  0x87   : > { %v575_v10 = vpop.permute.xlu0 %574 }
  0xfc   : > { %v347_v62 = vpop.f32.mrb[0].mxu0 }
  0xfd   : > { %v418_v63 = vpop.f32.mrb[0].mxu1  ;;  %v349_v1 = vpop.f32.mrb[1].mxu0 }
  0xfe   : > { %v565_v2 = vmax.f32 %v347_v62, %v418_v63  ;;  %v420_v3 = vpop.f32.mrb[1].mxu1 }
  0xff   : > { %v566_v4 = vmax.f32 %v349_v1, %v420_v3 }
 0x110   : > { %v489_v5 = vpop.f32.mrb[2].mxu0 }
 0x111   : > { %v560_v6 = vpop.f32.mrb[2].mxu1  ;;  %v491_v7 = vpop.f32.mrb[3].mxu0 }
 0x112   : > { %v567_v8 = vmax.f32 %v489_v5, %v560_v6  ;;  %v562_v9 = vpop.f32.mrb[3].mxu1 }
 0x113   : > { %v568_v54 = vmax.f32 %v491_v7, %v562_v9 }
 0x114   : > { %v569_v11 = vmax.f32 %v565_v2, %v567_v8 }
 0x115   : > { %v570_v12 = vmax.f32 %v566_v4, %v568_v54 }
 0x116   : > { %v577_v13 = vadd.f32 %v575_v10, %v569_v11 }
 0x117   : > { %v578_v14 = vadd.f32 %v575_v10, %v570_v12 }
 0x118   : > { %v579_v15 = vmax.f32 %v577_v13, 0.0 }
 0x119   : > { %v580_v16 = vmax.f32 %v578_v14, 0.0 }
 0x11a   : > { %581 = vst [vmem:[%s170_s25] sm:$0x3f] %v579_v15 }
 0x11b   : > { %582 = vst [vmem:[%s170_s25 + $0x8] sm:$0x3f] %v580_v16 }
 0x11c PF: > { %s13_s12 = sadd.s32 1, %s768_s12  }
 0x11d   : > { %p10_p4 = scmp.ge.s32.totalorder %s13_s12, 4  }
 0x11f   :  { %12 = sbr.rel (!%p10_p4) target bundleno = 1 (0x1), region = 62 }

// kernel: convnet_forward.4
= control target key start
LH: loop header
LB: loop body
LE: loop exit
PB: predicated region body
PF: predicated region fallthrough
CT: control target
= control target key end

     0   :  { %s635_s12 = smov 0   ;;  %s756_s0 = inlined_call_operand.vmem [shape: f32[2,150,512], index: 0, kind: input, shape index: {}]   ;;  %s757_s1 = inlined_call_operand.vmem [shape: f32[16,150], index: 1, kind: input, shape index: {}]   ;;  %s758_s2 = inlined_call_operand.vmem [shape: f32[16,1], index: 2, kind: input, shape index: {}]   ;;  %s759_s3 = inlined_call_operand.vmem [shape: f32[2,16,128], index: 3, kind: output, shape index: {}]  }
   0x1 LB: > { %s504_s13 = sadd.s32 4294967295, %s612_s12   ;;  %p508_p0 = scmp.ge.s32.totalorder %s612_s12, 1  ;;  %s612_s12 = sphi %s635_s12, %s13_s12  }
   0x2   : > { %p137_p1 = scmp.lt.s32.totalorder %s612_s12, 3 }
   0x4   : > { %p138_p2 = pnand %p508_p0, %p137_p1 }
   0x5   : > { %p161_p3 = scmp.lt.s32.totalorder (!%p138_p2), %s504_s13, 1  ;;  %v172_v0 = vld [vmem:[%s757_s1 + $0x8] sm:$0xff] (!%p138_p2)  ;;  %vm251_vm0 = vcmask (!%p138_p2), 179200   ;;  %v431_v1 = vld [vmem:[%s758_s2] sm:$0xff] (!%p138_p2)  ;;  %v614_v2 = vmov (!%p138_p2), 0   ;;  %vm258_vm1 = vcmask (!%p138_p2), 1045504  }
   0x6   : > { %141 = sbr.rel (%p138_p2) target bundleno = 286 (0x11e), region = 32  ;;  %514 = vmatprep.mubr.msk.f32.mxu0 (!%p138_p2), %vm251_vm0, %v172_v0  ;;  %518 = vmatprep.mubr.msk.f32.mxu1 (!%p138_p2), %vm251_vm0, %v172_v0  ;;  %v432_v3 = vld [vmem:[%s758_s2 + $0x8] sm:$0xff] (!%p138_p2) }
   0x7   : > { %605 = vset.pattern.permute.xlu0 (!%p138_p2), %v614_v2 }
   0x8   : > { %435 = vperm.xlu0 (!%p138_p2), %605, %v431_v1  }
   0xc   : > { %440 = vperm.xlu0 (!%p138_p2), %605, %v432_v3  }
   0xd   : > { %s761_s13 = smov (!%p161_p3, %s504_s13), 1 }
   0xe   : > { %s595_s18 = smul.u32 608, %s761_s13  ;;  %s522_s30 = sshll.u32 %s761_s13, 4 }
   0xf   : > { %s170_s6 = scalar_lea.vmem %s759_s3, %s522_s30 }
  0x10   : > { %s660_s23 = scalar_lea.vmem %s756_s0, %s595_s18 }
  0x11   : > { %v176_v4 = vld [vmem:[%s660_s23 + $0x8] sm:$0xff]  ;;  %v178_v6 = vld [vmem:[%s660_s23 + $0x18] sm:$0xff]  ;;  %v175_v9 = vld [vmem:[%s660_s23] sm:$0xff] }
  0x12   : > { %v180_v5 = vld [vmem:[%s660_s23 + $0x28] sm:$0xff]  ;;  %v182_v8 = vld [vmem:[%s660_s23 + $0x38] sm:$0xff]  ;;  %v179_v10 = vld [vmem:[%s660_s23 + $0x20] sm:$0xff] }
  0x13   : > { %v523_v7 = vpack.c.bf16 %v180_v5, %v176_v4  ;;  %v559_v11 = vpack.c.bf16 %v182_v8, %v178_v6  ;;  %v525_v12 = vpack.c.bf16 %v179_v10, %v175_v9  ;;  %v177_v13 = vld [vmem:[%s660_s23 + $0x10] sm:$0xff]  ;;  %v184_v15 = vld [vmem:[%s660_s23 + $0x48] sm:$0xff]  ;;  %v186_v18 = vld [vmem:[%s660_s23 + $0x58] sm:$0xff] }
  0x14   : > { %v181_v14 = vld [vmem:[%s660_s23 + $0x30] sm:$0xff]  ;;  %v188_v17 = vld [vmem:[%s660_s23 + $0x68] sm:$0xff]  ;;  %v190_v19 = vld [vmem:[%s660_s23 + $0x78] sm:$0xff] }
  0x15   : > { %524 = vmatprep.subr.bf16.mxu0 %v523_v7  ;;  %v561_v16 = vpack.c.bf16 %v181_v14, %v177_v13  ;;  %560 = vmatprep.subr.bf16.mxu1 %v559_v11  ;;  %v527_v20 = vpack.c.bf16 %v188_v17, %v184_v15  ;;  %v563_v21 = vpack.c.bf16 %v190_v19, %v186_v18  ;;  %v183_v22 = vld [vmem:[%s660_s23 + $0x40] sm:$0xff]  ;;  %v185_v24 = vld [vmem:[%s660_s23 + $0x50] sm:$0xff]  ;;  %v192_v27 = vld [vmem:[%s660_s23 + $0x88] sm:$0xff] }
  0x16   : > { %526 = vmatpush1.bf16.msra.mxu0 %v525_v12  ;;  %v187_v23 = vld [vmem:[%s660_s23 + $0x60] sm:$0xff]  ;;  %v189_v26 = vld [vmem:[%s660_s23 + $0x70] sm:$0xff]  ;;  %v196_v28 = vld [vmem:[%s660_s23 + $0xa8] sm:$0xff] }
  0x17   : > { %562 = vmatpush1.bf16.msra.mxu1 %v561_v16  ;;  %v529_v25 = vpack.c.bf16 %v187_v23, %v183_v22  ;;  %528 = vmatprep.subr.bf16.mxu0 %v527_v20  ;;  %v565_v29 = vpack.c.bf16 %v189_v26, %v185_v24  ;;  %v531_v30 = vpack.c.bf16 %v196_v28, %v192_v27  ;;  %v194_v31 = vld [vmem:[%s660_s23 + $0x98] sm:$0xff]  ;;  %v191_v33 = vld [vmem:[%s660_s23 + $0x80] sm:$0xff]  ;;  %v193_v36 = vld [vmem:[%s660_s23 + $0x90] sm:$0xff] }
  0x18   : > { %564 = vmatprep.subr.bf16.mxu1 %v563_v21  ;;  %v198_v32 = vld [vmem:[%s660_s23 + $0xb8] sm:$0xff]  ;;  %v195_v35 = vld [vmem:[%s660_s23 + $0xa0] sm:$0xff]  ;;  %v197_v37 = vld [vmem:[%s660_s23 + $0xb0] sm:$0xff] }
  0x19   : > { %v567_v34 = vpack.c.bf16 %v198_v32, %v194_v31  ;;  %v533_v38 = vpack.c.bf16 %v195_v35, %v191_v33  ;;  %v200_v39 = vld [vmem:[%s660_s23 + $0xc8] sm:$0xff]  ;;  %v202_v41 = vld [vmem:[%s660_s23 + $0xd8] sm:$0xff]  ;;  %v569_v42 = vpack.c.bf16 %v197_v37, %v193_v36  ;;  %v199_v45 = vld [vmem:[%s660_s23 + $0xc0] sm:$0xff] }
  0x1a   : > { %530 = vmatpush1.bf16.msra.mxu0 %v529_v25  ;;  %v204_v40 = vld [vmem:[%s660_s23 + $0xe8] sm:$0xff]  ;;  %v206_v44 = vld [vmem:[%s660_s23 + $0xf8] sm:$0xff]  ;;  %v203_v46 = vld [vmem:[%s660_s23 + $0xe0] sm:$0xff] }
  0x1b   : > { %566 = vmatpush1.bf16.msra.mxu1 %v565_v29  ;;  %532 = vmatprep.subr.bf16.mxu0 %v531_v30  ;;  %v535_v43 = vpack.c.bf16 %v204_v40, %v200_v39  ;;  %v571_v47 = vpack.c.bf16 %v206_v44, %v202_v41  ;;  %v201_v48 = vld [vmem:[%s660_s23 + $0xd0] sm:$0xff]  ;;  %v208_v50 = vld [vmem:[%s660_s23 + $0x108] sm:$0xff]  ;;  %v210_v52 = vld [vmem:[%s660_s23 + $0x118] sm:$0xff]  ;;  %v537_v54 = vpack.c.bf16 %v203_v46, %v199_v45 }
  0x1c   : > { %568 = vmatprep.subr.bf16.mxu1 %v567_v34  ;;  %v205_v49 = vld [vmem:[%s660_s23 + $0xf0] sm:$0xff]  ;;  %v212_v51 = vld [vmem:[%s660_s23 + $0x128] sm:$0xff]  ;;  %v214_v53 = vld [vmem:[%s660_s23 + $0x138] sm:$0xff] }
  0x1d   : > { %v573_v55 = vpack.c.bf16 %v205_v49, %v201_v48  ;;  %v539_v56 = vpack.c.bf16 %v212_v51, %v208_v50  ;;  %v207_v57 = vld [vmem:[%s660_s23 + $0x100] sm:$0xff]  ;;  %v209_v59 = vld [vmem:[%s660_s23 + $0x110] sm:$0xff]  ;;  %v575_v60 = vpack.c.bf16 %v214_v53, %v210_v52  ;;  %v216_v62 = vld [vmem:[%s660_s23 + $0x148] sm:$0xff] }
  0x1e   : > { %534 = vmatpush1.bf16.msra.mxu0 %v533_v38  ;;  %v211_v58 = vld [vmem:[%s660_s23 + $0x120] sm:$0xff]  ;;  %v213_v61 = vld [vmem:[%s660_s23 + $0x130] sm:$0xff]  ;;  %v220_v63 = vld [vmem:[%s660_s23 + $0x168] sm:$0xff] }
  0x1f   : > { %570 = vmatpush1.bf16.msra.mxu1 %v569_v42  ;;  %536 = vmatprep.subr.bf16.mxu0 %v535_v43  ;;  %v218_v0 = vld [vmem:[%s660_s23 + $0x158] sm:$0xff]  ;;  %v541_v2 = vpack.c.bf16 %v211_v58, %v207_v57  ;;  %v577_v3 = vpack.c.bf16 %v213_v61, %v209_v59  ;;  %v543_v4 = vpack.c.bf16 %v220_v63, %v216_v62  ;;  %v215_v5 = vld [vmem:[%s660_s23 + $0x140] sm:$0xff]  ;;  %v217_v7 = vld [vmem:[%s660_s23 + $0x150] sm:$0xff] }
  0x20   : > { %572 = vmatprep.subr.bf16.mxu1 %v571_v47  ;;  %v222_v1 = vld [vmem:[%s660_s23 + $0x178] sm:$0xff]  ;;  %v219_v6 = vld [vmem:[%s660_s23 + $0x160] sm:$0xff]  ;;  %v221_v9 = vld [vmem:[%s660_s23 + $0x170] sm:$0xff] }
  0x21   : > { %v579_v8 = vpack.c.bf16 %v222_v1, %v218_v0  ;;  %v224_v10 = vld [vmem:[%s660_s23 + $0x188] sm:$0xff]  ;;  %v226_v12 = vld [vmem:[%s660_s23 + $0x198] sm:$0xff]  ;;  %v545_v14 = vpack.c.bf16 %v219_v6, %v215_v5  ;;  %v581_v15 = vpack.c.bf16 %v221_v9, %v217_v7  ;;  %v223_v17 = vld [vmem:[%s660_s23 + $0x180] sm:$0xff] }
  0x22   : > { %538 = vmatpush1.bf16.msra.mxu0 %v537_v54  ;;  %v228_v11 = vld [vmem:[%s660_s23 + $0x1a8] sm:$0xff]  ;;  %v230_v13 = vld [vmem:[%s660_s23 + $0x1b8] sm:$0xff]  ;;  %v227_v18 = vld [vmem:[%s660_s23 + $0x1a0] sm:$0xff] }
  0x23   : > { %574 = vmatpush1.bf16.msra.mxu1 %v573_v55  ;;  %540 = vmatprep.subr.bf16.mxu0 %v539_v56  ;;  %v547_v16 = vpack.c.bf16 %v228_v11, %v224_v10  ;;  %v225_v19 = vld [vmem:[%s660_s23 + $0x190] sm:$0xff]  ;;  %v583_v20 = vpack.c.bf16 %v230_v13, %v226_v12  ;;  %v232_v22 = vld [vmem:[%s660_s23 + $0x1c8] sm:$0xff]  ;;  %v234_v24 = vld [vmem:[%s660_s23 + $0x1d8] sm:$0xff]  ;;  %v549_v26 = vpack.c.bf16 %v227_v18, %v223_v17 }
  0x24   : > { %576 = vmatprep.subr.bf16.mxu1 %v575_v60  ;;  %v229_v21 = vld [vmem:[%s660_s23 + $0x1b0] sm:$0xff]  ;;  %v236_v23 = vld [vmem:[%s660_s23 + $0x1e8] sm:$0xff]  ;;  %v238_v25 = vld [vmem:[%s660_s23 + $0x1f8] sm:$0xff] }
  0x25   : > { %v585_v27 = vpack.c.bf16 %v229_v21, %v225_v19  ;;  %v551_v28 = vpack.c.bf16 %v236_v23, %v232_v22  ;;  %v231_v29 = vld [vmem:[%s660_s23 + $0x1c0] sm:$0xff]  ;;  %v233_v31 = vld [vmem:[%s660_s23 + $0x1d0] sm:$0xff]  ;;  %v587_v32 = vpack.c.bf16 %v238_v25, %v234_v24  ;;  %v240_v34 = vld [vmem:[%s660_s23 + $0x208] sm:$0xff] }
  0x26   : > { %542 = vmatpush1.bf16.msra.mxu0 %v541_v2  ;;  %v235_v30 = vld [vmem:[%s660_s23 + $0x1e0] sm:$0xff]  ;;  %v237_v33 = vld [vmem:[%s660_s23 + $0x1f0] sm:$0xff]  ;;  %v244_v35 = vld [vmem:[%s660_s23 + $0x228] sm:$0xff] }
  0x27   : > { %578 = vmatpush1.bf16.msra.mxu1 %v577_v3  ;;  %544 = vmatprep.subr.bf16.mxu0 %v543_v4  ;;  %v242_v36 = vld [vmem:[%s660_s23 + $0x218] sm:$0xff]  ;;  %v553_v38 = vpack.c.bf16 %v235_v30, %v231_v29  ;;  %v589_v39 = vpack.c.bf16 %v237_v33, %v233_v31  ;;  %v555_v40 = vpack.c.bf16 %v244_v35, %v240_v34  ;;  %v239_v41 = vld [vmem:[%s660_s23 + $0x200] sm:$0xff]  ;;  %v241_v44 = vld [vmem:[%s660_s23 + $0x210] sm:$0xff] }
  0x28   : > { %580 = vmatprep.subr.bf16.mxu1 %v579_v8  ;;  %v246_v37 = vld [vmem:[%s660_s23 + $0x238] sm:$0xff]  ;;  %v243_v42 = vld [vmem:[%s660_s23 + $0x220] sm:$0xff]  ;;  %v245_v45 = vld [vmem:[%s660_s23 + $0x230] sm:$0xff] }
  0x29   : > { %v591_v43 = vpack.c.bf16 %v246_v37, %v242_v36  ;;  %v557_v46 = vpack.c.bf16 %v243_v42, %v239_v41  ;;  %v593_v47 = vpack.c.bf16 %v245_v45, %v241_v44  ;;  %v248_v48 = vld [vmem:[%s660_s23 + $0x248] sm:$0x3f]  ;;  %v250_v49 = vld [vmem:[%s660_s23 + $0x258] sm:$0x3f]  ;;  %v247_v50 = vld [vmem:[%s660_s23 + $0x240] sm:$0x3f] }
  0x2a   : > { %546 = vmatpush1.bf16.msra.mxu0 %v545_v14  ;;  %v249_v51 = vld [vmem:[%s660_s23 + $0x250] sm:$0x3f]  ;;  %v171_v52 = vld [vmem:[%s757_s1] sm:$0xff]  ;;  %v174_v53 = vld [vmem:[%s757_s1 + $0x18] sm:$0xff] }
  0x2b   : > { %582 = vmatpush1.bf16.msra.mxu1 %v581_v15  ;;  %548 = vmatprep.subr.bf16.mxu0 %v547_v16  ;;  %v173_v54 = vld [vmem:[%s757_s1 + $0x10] sm:$0xff] }
  0x2c   : > { %584 = vmatprep.subr.bf16.mxu1 %v583_v20 }
  0x2e   : > { %550 = vmatpush1.bf16.msra.mxu0 %v549_v26 }
  0x2f   : > { %586 = vmatpush1.bf16.msra.mxu1 %v585_v27  ;;  %552 = vmatprep.subr.bf16.mxu0 %v551_v28 }
  0x30   : > { %588 = vmatprep.subr.bf16.mxu1 %v587_v32 }
  0x32   : > { %554 = vmatpush1.bf16.msra.mxu0 %v553_v38 }
  0x33   : > { %590 = vmatpush1.bf16.msra.mxu1 %v589_v39  ;;  %556 = vmatprep.subr.bf16.mxu0 %v555_v40 }
  0x34   : > { %592 = vmatprep.subr.bf16.mxu1 %v591_v43 }
  0x36   : > { %558 = vmatpush1.bf16.msra.mxu0 %v557_v46 }
  0x37   : > { %594 = vmatpush1.bf16.msra.mxu1 %v593_v47  ;;  %512 = vmatprep.subr.msk.mxu0 %vm258_vm1, %v248_v48 }
  0x38   : > { %516 = vmatprep.subr.msk.mxu1 %vm258_vm1, %v250_v49 }
  0x3a   : > { %513 = vmatpush1.msk.msra.mxu0 %vm258_vm1, %v247_v50 }
  0x3b   : > { %517 = vmatpush1.msk.msra.mxu1 %vm258_vm1, %v249_v51  ;;  %336 = vmatmul.mubr.f32.vlgmr.msra.gmra.mrb[0].mxu0 %v171_v52 }
  0x3c   : > { %413 = vmatmul.mubr.f32.vlgmr.msra.gmra.mrb[0].mxu1 %v171_v52  ;;  %515 = vmatprep.mubr.msk.f32.mxu0 %vm251_vm0, %v174_v53 }
  0x3d   : > { %519 = vmatprep.mubr.msk.f32.mxu1 %vm251_vm0, %v174_v53 }
  0x3f   : > { %342 = vmatmul.mubr.f32.gmra.mrb[2].mxu0 %v173_v54 }
  0x40   : > { %419 = vmatmul.mubr.f32.gmra.mrb[2].mxu1 %v173_v54 }
  0x87   : > { %v436_v61 = vpop.permute.xlu0 %435 }
  0x8b   : > { %v441_v8 = vpop.permute.xlu0 %440 }
 0x10e   : > { %v337_v55 = vpop.f32.mrb[0].mxu0 }
 0x10f   : > { %v414_v56 = vpop.f32.mrb[0].mxu1  ;;  %v339_v57 = vpop.f32.mrb[1].mxu0 }
 0x110   : > { %v425_v58 = vmax.f32 %v337_v55, %v339_v57  ;;  %v416_v59 = vpop.f32.mrb[1].mxu1 }
 0x111   : > { %v427_v60 = vmax.f32 %v414_v56, %v416_v59 }
 0x112   : > { %v343_v62 = vpop.f32.mrb[2].mxu0 }
 0x113   : > { %v429_v63 = vmax.f32 %v425_v58, %v427_v60  ;;  %v420_v0 = vpop.f32.mrb[2].mxu1  ;;  %v345_v1 = vpop.f32.mrb[3].mxu0 }
 0x114   : > { %v426_v2 = vmax.f32 %v343_v62, %v345_v1  ;;  %v422_v3 = vpop.f32.mrb[3].mxu1 }
 0x115   : > { %v443_v4 = vadd.f32 %v436_v61, %v429_v63  ;;  %v428_v5 = vmax.f32 %v420_v0, %v422_v3 }
 0x117   : > { %v445_v6 = vmax.f32 %v443_v4, 0.0  ;;  %v430_v7 = vmax.f32 %v426_v2, %v428_v5 }
 0x119   : > { %447 = vst [vmem:[%s170_s6] sm:$0xff] %v445_v6  ;;  %v444_v9 = vadd.f32 %v441_v8, %v430_v7 }
 0x11b   : > { %v446_v10 = vmax.f32 %v444_v9, 0.0 }
 0x11d   : > { %448 = vst [vmem:[%s170_s6 + $0x8] sm:$0xff] %v446_v10 }
 0x11e PF: > { %s13_s12 = sadd.s32 1, %s612_s12  }
 0x11f   : > { %p10_p4 = scmp.ge.s32.totalorder %s13_s12, 4  }
 0x121   :  { %12 = sbr.rel (!%p10_p4) target bundleno = 1 (0x1), region = 62 }

// kernel: convnet_forward.5
= control target key start
LH: loop header
LB: loop body
LE: loop exit
PB: predicated region body
PF: predicated region fallthrough
CT: control target
= control target key end

     0   :  { %v732_v4 = vmov 0.0|0.0   ;;  %v733_v26 = vmov 1983009808   ;;  %v90_v28 = vlaneseq  ;;  %vm106_vm0 = vcmask 130048   ;;  %s1072_s0 = inlined_call_operand.vmem [shape: f32[2,400], index: 0, kind: input, shape index: {}]   ;;  %s1073_s1 = inlined_call_operand.vmem [shape: f32[400,128], index: 1, kind: input, shape index: {}]   ;;  %s1074_s2 = inlined_call_operand.vmem [shape: f32[1,128], index: 2, kind: input, shape index: {}]   ;;  %s1075_s3 = inlined_call_operand.vmem [shape: f32[128,128], index: 3, kind: input, shape index: {}]   ;;  %s1076_s4 = inlined_call_operand.vmem [shape: f32[1,128], index: 4, kind: input, shape index: {}]   ;;  %s1077_s5 = inlined_call_operand.vmem [shape: f32[128,128], index: 5, kind: input, shape index: {}]   ;;  %s1078_s6 = inlined_call_operand.vmem [shape: f32[1,128], index: 6, kind: input, shape index: {}]   ;;  %s1079_s7 = inlined_call_operand.hbm [shape: f32[2,128], index: 7, kind: output, shape index: {}]  }
   0x1   :  { %v44_v0 = vld [vmem:[%s1073_s1 + $0x80] sm:$0xff]  ;;  %v45_v1 = vld [vmem:[%s1073_s1 + $0x88] sm:$0xff]  ;;  %627 = vmatprep.subr.bf16.mxu1 %v732_v4  ;;  %v46_v10 = vld [vmem:[%s1073_s1 + $0x90] sm:$0xff]  ;;  %v88_v27 = vunpack.c.l.s4 %v733_v26 }
   0x2   :  { %v28_v2 = vld [vmem:[%s1073_s1] sm:$0xff]  ;;  %v595_v3 = vpack.c.bf16 %v45_v1, %v44_v0  ;;  %v29_v5 = vld [vmem:[%s1073_s1 + $0x8] sm:$0xff]  ;;  %v47_v11 = vld [vmem:[%s1073_s1 + $0x98] sm:$0xff]  ;;  %v91_v39 = vshrl.u32 %v90_v28, 7 }
   0x3   :  { %v60_v6 = vld [vmem:[%s1073_s1 + $0x100] sm:$0xff]  ;;  %v61_v7 = vld [vmem:[%s1073_s1 + $0x108] sm:$0xff]  ;;  %v597_v8 = vpack.c.bf16 %v29_v5, %v28_v2  ;;  %v30_v12 = vld [vmem:[%s1073_s1 + $0x10] sm:$0xff]  ;;  %v599_v13 = vpack.c.bf16 %v47_v11, %v46_v10  ;;  %v89_v38 = vunpack.c.0.s8 %v88_v27 }
   0x4   :  { %v628_v9 = vpack.c.bf16 %v61_v7, %v60_v6  ;;  %596 = vmatprep.subr.bf16.mxu0 %v595_v3  ;;  %v31_v14 = vld [vmem:[%s1073_s1 + $0x18] sm:$0xff]  ;;  %v62_v15 = vld [vmem:[%s1073_s1 + $0x110] sm:$0xff]  ;;  %v48_v19 = vld [vmem:[%s1073_s1 + $0xa0] sm:$0xff] }
   0x5   :  { %v63_v16 = vld [vmem:[%s1073_s1 + $0x118] sm:$0xff]  ;;  %598 = vmatpush3.bf16.msra.mxu0 %v597_v8  ;;  %v601_v17 = vpack.c.bf16 %v31_v14, %v30_v12  ;;  %v49_v20 = vld [vmem:[%s1073_s1 + $0xa8] sm:$0xff]  ;;  %v32_v21 = vld [vmem:[%s1073_s1 + $0x20] sm:$0xff]  ;;  %v92_v49 = vsub.s32 %v89_v38, %v91_v39 }
   0x6   :  { %629 = vmatpush1.bf16.msra.mxu1 %v628_v9  ;;  %v631_v18 = vpack.c.bf16 %v63_v16, %v62_v15  ;;  %600 = vmatprep.subr.bf16.mxu0 %v599_v13  ;;  %v603_v22 = vpack.c.bf16 %v49_v20, %v48_v19  ;;  %v33_v23 = vld [vmem:[%s1073_s1 + $0x28] sm:$0xff]  ;;  %v64_v24 = vld [vmem:[%s1073_s1 + $0x120] sm:$0xff]  ;;  %v50_v29 = vld [vmem:[%s1073_s1 + $0xb0] sm:$0xff] }
   0x7   :  { %630 = vmatprep.subr.bf16.mxu1 %v732_v4  ;;  %v65_v25 = vld [vmem:[%s1073_s1 + $0x128] sm:$0xff]  ;;  %v51_v30 = vld [vmem:[%s1073_s1 + $0xb8] sm:$0xff]  ;;  %v605_v31 = vpack.c.bf16 %v33_v23, %v32_v21  ;;  %v34_v33 = vld [vmem:[%s1073_s1 + $0x30] sm:$0xff] }
   0x8   :  { %v634_v32 = vpack.c.bf16 %v65_v25, %v64_v24  ;;  %v607_v34 = vpack.c.bf16 %v51_v30, %v50_v29  ;;  %v35_v35 = vld [vmem:[%s1073_s1 + $0x38] sm:$0xff]  ;;  %v66_v36 = vld [vmem:[%s1073_s1 + $0x130] sm:$0xff]  ;;  %v52_v40 = vld [vmem:[%s1073_s1 + $0xc0] sm:$0xff] }
   0x9   :  { %602 = vmatpush3.bf16.msra.mxu0 %v601_v17  ;;  %v67_v37 = vld [vmem:[%s1073_s1 + $0x138] sm:$0xff]  ;;  %v53_v41 = vld [vmem:[%s1073_s1 + $0xc8] sm:$0xff]  ;;  %v609_v42 = vpack.c.bf16 %v35_v35, %v34_v33  ;;  %v36_v44 = vld [vmem:[%s1073_s1 + $0x40] sm:$0xff] }
   0xa   :  { %632 = vmatpush1.bf16.msra.mxu1 %v631_v18  ;;  %604 = vmatprep.subr.bf16.mxu0 %v603_v22  ;;  %v637_v43 = vpack.c.bf16 %v67_v37, %v66_v36  ;;  %v611_v45 = vpack.c.bf16 %v53_v41, %v52_v40  ;;  %v37_v46 = vld [vmem:[%s1073_s1 + $0x48] sm:$0xff]  ;;  %v68_v47 = vld [vmem:[%s1073_s1 + $0x140] sm:$0xff]  ;;  %v54_v50 = vld [vmem:[%s1073_s1 + $0xd0] sm:$0xff] }
   0xb   :  { %633 = vmatprep.subr.bf16.mxu1 %v732_v4  ;;  %v69_v48 = vld [vmem:[%s1073_s1 + $0x148] sm:$0xff]  ;;  %v55_v51 = vld [vmem:[%s1073_s1 + $0xd8] sm:$0xff]  ;;  %v613_v52 = vpack.c.bf16 %v37_v46, %v36_v44  ;;  %v38_v54 = vld [vmem:[%s1073_s1 + $0x50] sm:$0xff] }
   0xc   :  { %v640_v53 = vpack.c.bf16 %v69_v48, %v68_v47  ;;  %v27_v55 = vld [vmem:[%s1072_s0] sm:$0xff]  ;;  %v615_v56 = vpack.c.bf16 %v55_v51, %v54_v50  ;;  %v39_v57 = vld [vmem:[%s1073_s1 + $0x58] sm:$0xff]  ;;  %v70_v58 = vld [vmem:[%s1073_s1 + $0x150] sm:$0xff] }
   0xd   :  { %606 = vmatpush3.bf16.msra.mxu0 %v605_v31  ;;  %v71_v59 = vld [vmem:[%s1073_s1 + $0x158] sm:$0xff]  ;;  %v86_v60 = vcombine.high %v27_v55, %v27_v55  ;;  %v93_v61 = vrot.slane %v27_v55, %v92_v49  ;;  %v56_v62 = vld [vmem:[%s1073_s1 + $0xe0] sm:$0xff]  ;;  %v57_v63 = vld [vmem:[%s1073_s1 + $0xe8] sm:$0xff]  ;;  %v617_v2 = vpack.c.bf16 %v39_v57, %v38_v54 }
   0xe   :  { %635 = vmatpush1.bf16.msra.mxu1 %v634_v32  ;;  %608 = vmatprep.subr.bf16.mxu0 %v607_v34  ;;  %v643_v3 = vpack.c.bf16 %v71_v59, %v70_v58  ;;  %v40_v5 = vld [vmem:[%s1073_s1 + $0x60] sm:$0xff]  ;;  %v41_v6 = vld [vmem:[%s1073_s1 + $0x68] sm:$0xff]  ;;  %v619_v7 = vpack.c.bf16 %v57_v63, %v56_v62 }
   0xf   :  { %636 = vmatprep.subr.bf16.mxu1 %v732_v4  ;;  %v101_v0 = vcombine.high %v93_v61, %v93_v61  ;;  %v100_v1 = vrot.slane %v86_v60, %v92_v49  ;;  %v72_v8 = vld [vmem:[%s1073_s1 + $0x160] sm:$0xff]  ;;  %v73_v9 = vld [vmem:[%s1073_s1 + $0x168] sm:$0xff] }
  0x11   :  { %610 = vmatpush3.bf16.msra.mxu0 %v609_v42  ;;  %v102_v10 = vcombine.high %v100_v1, %v100_v1 }
  0x12   :  { %638 = vmatpush1.bf16.msra.mxu1 %v637_v43  ;;  %612 = vmatprep.subr.bf16.mxu0 %v611_v45 }
  0x13   :  { %639 = vmatprep.subr.bf16.mxu1 %v732_v4 }
  0x15   :  { %614 = vmatpush3.bf16.msra.mxu0 %v613_v52 }
  0x16   :  { %641 = vmatpush1.bf16.msra.mxu1 %v640_v53  ;;  %616 = vmatprep.subr.bf16.mxu0 %v615_v56 }
  0x17   :  { %642 = vmatprep.subr.bf16.mxu1 %v732_v4 }
  0x18   :  { %12 = vsyncpa [#allocation3], 0  ;;  %v58_v11 = vld [vmem:[%s1073_s1 + $0xf0] sm:$0xff]  ;;  %v59_v12 = vld [vmem:[%s1073_s1 + $0xf8] sm:$0xff]  ;;  %173 = vmatprep.mubr.f32.mxu0 %v101_v0  ;;  %453 = vmatprep.mubr.msk.f32.mxu1 %vm106_vm0, %v102_v10  ;;  %v621_v13 = vpack.c.bf16 %v41_v6, %v40_v5  ;;  %v646_v14 = vpack.c.bf16 %v73_v9, %v72_v8  ;;  %vm734_vm1 = vmmov 0   ;;  %v735_v49 = vmov 0.0  }
  0x19   :  { %618 = vmatpush3.bf16.msra.mxu0 %v617_v2  ;;  %v42_v15 = vld [vmem:[%s1073_s1 + $0x70] sm:$0xff]  ;;  %v623_v16 = vpack.c.bf16 %v59_v12, %v58_v11  ;;  %v43_v17 = vld [vmem:[%s1073_s1 + $0x78] sm:$0xff]  ;;  %v76_v22 = vld [vmem:[%s1073_s1 + $0x180] sm:$0xff]  ;;  %s736_s25 = smov [#allocation2]  }
  0x1a   :  { %644 = vmatpush1.bf16.msra.mxu1 %v643_v3  ;;  %620 = vmatprep.subr.bf16.mxu0 %v619_v7  ;;  %v74_v18 = vld [vmem:[%s1073_s1 + $0x170] sm:$0xff]  ;;  %v75_v19 = vld [vmem:[%s1073_s1 + $0x178] sm:$0xff]  ;;  %v625_v20 = vpack.c.bf16 %v43_v17, %v42_v15  ;;  %v77_v23 = vld [vmem:[%s1073_s1 + $0x188] sm:$0xff]  ;;  %s444_s26 = sshll.u32 %s736_s25, 4  ;;  %s445_s26 = int_to_ptr.vmem [resolvable:$true] %s444_s26 }
  0x1b   :  { %645 = vmatprep.subr.bf16.mxu1 %v732_v4  ;;  %v649_v21 = vpack.c.bf16 %v75_v19, %v74_v18  ;;  %v250_v24 = vld [vmem:[%s1075_s3] sm:$0xff]  ;;  %v251_v25 = vld [vmem:[%s1075_s3 + $0x8] sm:$0xff]  ;;  %v652_v26 = vpack.c.bf16 %v77_v23, %v76_v22  ;;  %v252_v28 = vld [vmem:[%s1075_s3 + $0x10] sm:$0xff]  ;;  %p713_p1 = scmp.lt.s32.totalorder %s445_s26, %s445_s26 }
  0x1c   :  { %v655_v27 = vpack.c.bf16 %v251_v25, %v250_v24  ;;  %v253_v29 = vld [vmem:[%s1075_s3 + $0x18] sm:$0xff]  ;;  %v254_v31 = vld [vmem:[%s1075_s3 + $0x20] sm:$0xff]  ;;  %v255_v32 = vld [vmem:[%s1075_s3 + $0x28] sm:$0xff] }
  0x1d   :  { %622 = vmatpush3.bf16.msra.mxu0 %v621_v13  ;;  %v658_v30 = vpack.c.bf16 %v253_v29, %v252_v28  ;;  %v661_v33 = vpack.c.bf16 %v255_v32, %v254_v31  ;;  %v256_v34 = vld [vmem:[%s1075_s3 + $0x30] sm:$0xff]  ;;  %v257_v35 = vld [vmem:[%s1075_s3 + $0x38] sm:$0xff]  ;;  %v258_v37 = vld [vmem:[%s1075_s3 + $0x40] sm:$0xff] }
  0x1e   :  { %647 = vmatpush1.bf16.msra.mxu1 %v646_v14  ;;  %624 = vmatprep.subr.bf16.mxu0 %v623_v16  ;;  %v664_v36 = vpack.c.bf16 %v257_v35, %v256_v34  ;;  %v259_v38 = vld [vmem:[%s1075_s3 + $0x48] sm:$0xff]  ;;  %v260_v40 = vld [vmem:[%s1075_s3 + $0x50] sm:$0xff]  ;;  %v261_v41 = vld [vmem:[%s1075_s3 + $0x58] sm:$0xff] }
  0x1f   :  { %648 = vmatprep.subr.bf16.mxu1 %v732_v4  ;;  %v667_v39 = vpack.c.bf16 %v259_v38, %v258_v37  ;;  %v670_v42 = vpack.c.bf16 %v261_v41, %v260_v40  ;;  %v262_v43 = vld [vmem:[%s1075_s3 + $0x60] sm:$0xff]  ;;  %v263_v44 = vld [vmem:[%s1075_s3 + $0x68] sm:$0xff]  ;;  %v264_v46 = vld [vmem:[%s1075_s3 + $0x70] sm:$0xff] }
  0x20   :  { %v673_v45 = vpack.c.bf16 %v263_v44, %v262_v43  ;;  %v265_v47 = vld [vmem:[%s1075_s3 + $0x78] sm:$0xff]  ;;  %v344_v50 = vld [vmem:[%s1077_s5] sm:$0xff]  ;;  %v345_v51 = vld [vmem:[%s1077_s5 + $0x8] sm:$0xff] }
  0x21   :  { %626 = vmatpush3.bf16.msra.mxu0 %v625_v20  ;;  %v676_v48 = vpack.c.bf16 %v265_v47, %v264_v46  ;;  %v346_v52 = vld [vmem:[%s1077_s5 + $0x10] sm:$0xff]  ;;  %v679_v53 = vpack.c.bf16 %v345_v51, %v344_v50  ;;  %v347_v54 = vld [vmem:[%s1077_s5 + $0x18] sm:$0xff]  ;;  %v348_v56 = vld [vmem:[%s1077_s5 + $0x20] sm:$0xff] }
  0x22   :  { %650 = vmatpush1.bf16.msra.mxu1 %v649_v21  ;;  %654 = vmatprep.subr.bf16.mxu0 %v732_v4  ;;  %v682_v55 = vpack.c.bf16 %v347_v54, %v346_v52  ;;  %v349_v57 = vld [vmem:[%s1077_s5 + $0x28] sm:$0xff]  ;;  %v350_v59 = vld [vmem:[%s1077_s5 + $0x30] sm:$0xff]  ;;  %v351_v60 = vld [vmem:[%s1077_s5 + $0x38] sm:$0xff] }
  0x23   :  { %651 = vmatprep.subr.bf16.mxu1 %v732_v4  ;;  %v685_v58 = vpack.c.bf16 %v349_v57, %v348_v56  ;;  %v352_v62 = vld [vmem:[%s1077_s5 + $0x40] sm:$0xff]  ;;  %v353_v63 = vld [vmem:[%s1077_s5 + $0x48] sm:$0xff]  ;;  %v355_v2 = vld [vmem:[%s1077_s5 + $0x58] sm:$0xff] }
  0x24   :  { %174 = vmatmul.mubr.f32.vlgmr.msra.gmra.mrb[0].mxu0 %v93_v61  ;;  %v688_v61 = vpack.c.bf16 %v351_v60, %v350_v59  ;;  %v691_v0 = vpack.c.bf16 %v353_v63, %v352_v62  ;;  %v356_v5 = vld [vmem:[%s1077_s5 + $0x60] sm:$0xff]  ;;  %v357_v6 = vld [vmem:[%s1077_s5 + $0x68] sm:$0xff]  ;;  %v358_v17 = vld [vmem:[%s1077_s5 + $0x70] sm:$0xff] }
  0x25   :  { %656 = vmatpush3.bf16.msra.mxu0 %v655_v27  ;;  %557 = vmatprep.mubr.msk.f32.mxu0 %vm734_vm1, %v735_v49  ;;  %v697_v7 = vpack.c.bf16 %v357_v6, %v356_v5  ;;  %v452_v10 = vld [vmem:[%s1074_s2] ss:$0 sm:$0xff] }
  0x26   :  { %653 = vmatpush1.bf16.msra.mxu1 %v652_v26  ;;  %657 = vmatprep.subr.bf16.mxu0 %v732_v4  ;;  %v454_v19 = vld [vmem:[%s1076_s4] ss:$0 sm:$0xff] }
  0x27   :  { %678 = vmatprep.subr.bf16.mxu1 %v732_v4  ;;  %v455_v24 = vld [vmem:[%s1078_s6] ss:$0 sm:$0xff] }
  0x29   :  { %244 = vmatmul.mubr.f32.vlgmr.msra.gmra.mrb[0].mxu1 %v100_v1  ;;  %659 = vmatpush3.bf16.msra.mxu0 %v658_v30  ;;  %v354_v1 = vld [vmem:[%s1077_s5 + $0x50] sm:$0xff] }
  0x2a   :  { %660 = vmatprep.subr.bf16.mxu0 %v732_v4  ;;  %592 = vmatprep.mubr.msk.f32.mxu1 %vm734_vm1, %v735_v49  ;;  %v694_v3 = vpack.c.bf16 %v355_v2, %v354_v1 }
  0x2b   :  { %680 = vmatpush3.bf16.msra.mxu1 %v679_v53 }
  0x2c   :  { %681 = vmatprep.subr.bf16.mxu1 %v732_v4 }
  0x2d   :  { %662 = vmatpush3.bf16.msra.mxu0 %v661_v33 }
  0x2e   :  { %663 = vmatprep.subr.bf16.mxu0 %v732_v4 }
  0x2f   :  { %683 = vmatpush3.bf16.msra.mxu1 %v682_v55 }
  0x30   :  { %684 = vmatprep.subr.bf16.mxu1 %v732_v4 }
  0x31   :  { %665 = vmatpush3.bf16.msra.mxu0 %v664_v36 }
  0x32   :  { %666 = vmatprep.subr.bf16.mxu0 %v732_v4 }
  0x33   :  { %686 = vmatpush3.bf16.msra.mxu1 %v685_v58 }
  0x34   :  { %687 = vmatprep.subr.bf16.mxu1 %v732_v4 }
  0x35   :  { %668 = vmatpush3.bf16.msra.mxu0 %v667_v39 }
  0x36   :  { %669 = vmatprep.subr.bf16.mxu0 %v732_v4 }
  0x37   :  { %689 = vmatpush3.bf16.msra.mxu1 %v688_v61 }
  0x38   :  { %690 = vmatprep.subr.bf16.mxu1 %v732_v4 }
  0x39   :  { %671 = vmatpush3.bf16.msra.mxu0 %v670_v42 }
  0x3a   :  { %672 = vmatprep.subr.bf16.mxu0 %v732_v4 }
  0x3b   :  { %692 = vmatpush3.bf16.msra.mxu1 %v691_v0 }
  0x3c   :  { %693 = vmatprep.subr.bf16.mxu1 %v732_v4 }
  0x3d   :  { %674 = vmatpush3.bf16.msra.mxu0 %v673_v45 }
  0x3e   :  { %675 = vmatprep.subr.bf16.mxu0 %v732_v4 }
  0x3f   :  { %695 = vmatpush3.bf16.msra.mxu1 %v694_v3 }
  0x40   :  { %696 = vmatprep.subr.bf16.mxu1 %v732_v4 }
  0x41   :  { %677 = vmatpush3.bf16.msra.mxu0 %v676_v48 }
  0x43   :  { %698 = vmatpush3.bf16.msra.mxu1 %v697_v7 }
  0x44   :  { %699 = vmatprep.subr.bf16.mxu1 %v732_v4  ;;  %v359_v4 = vld [vmem:[%s1077_s5 + $0x78] sm:$0xff]  ;;  %s708_s5 = scalar_lea.vmem %s445_s26, 32 }
  0x45   :  { %v700_v18 = vpack.c.bf16 %v359_v4, %v358_v17  ;;  %p709_p0 = scmp.ne.s32.totalorder %s445_s26, %s708_s5  ;;  %p714_p2 = scmp.lt.s32.totalorder %s708_s5, %s708_s5 }
  0x47   :  { %701 = vmatpush3.bf16.msra.mxu1 %v700_v18  ;;  %p715_p3 = por %p714_p2, %p713_p1 }
  0x49   :  { %p716_p4 = pnand %p715_p3, %p709_p0 }
  0xf7   :  { %v488_v8 = vpop.f32.mrb[0].mxu0 }
  0xf8   :  { %v489_v9 = vpop.f32.mrb[1].mxu0 }
  0xf9   :  { %v490_v11 = vadd.f32 %v489_v9, %v488_v8 }
  0xfb   :  { %v176_v12 = vadd.f32 %v490_v11, %v452_v10 }
  0xfc   :  { %v245_v13 = vpop.f32.mrb[0].mxu1 }
  0xfd   :  { %v247_v14 = vpop.f32.mrb[1].mxu1  ;;  %v246_v15 = vadd.f32 %v245_v13, %v176_v12 }
  0xff   :  { %v249_v16 = vmax.f32 %v246_v15, 0.0 }
 0x101   :  { %558 = vmatmul.mubr.f32.vlgmr.msra.gmra.mrb[2].mxu0 %v249_v16 }
 0x1d4   :  { %v339_v20 = vpop.f32.mrb[2].mxu0 }
 0x1d5   :  { %v340_v21 = vadd.f32 %v454_v19, %v339_v20  ;;  %v559_v22 = vpop.f32.mrb[3].mxu0 }
 0x1d7   :  { %v343_v23 = vmax.f32 %v340_v21, 0.0 }
 0x1d9   :  { %593 = vmatmul.mubr.f32.vlgmr.msra.gmra.mrb[2].mxu1 %v343_v23 }
 0x2ac   :  { %v433_v25 = vpop.f32.mrb[2].mxu1 }
 0x2ad   :  { %v434_v26 = vadd.f32 %v455_v24, %v433_v25  ;;  %v594_v27 = vpop.f32.mrb[3].mxu1 }
 0x2af   :  { %437 = vst [vmem:[#allocation2] sm:$0x3] %v434_v26 }
 0x2b0   :  { %719 = shalt.err (!%p716_p4)
}
 0x2b1   :  { %s720_s28 = scalar_lea.hbm %s1079_s7, 32 }
 0x2b2   :  { %p721_p5 = scmp.ne.s32.totalorder %s1079_s7, %s720_s28  ;;  %p724_p6 = scmp.lt.u32.totalorder %s720_s28, %s1079_s7 }
 0x2b4   :  { %p726_p7 = pnand %p724_p6, %p721_p5 }
 0x2b6   :  { %729 = shalt.err (!%p726_p7)
}
 0x2b7   :  { %447 = dma.vmem_to_hbm [thread:$0]  %s445_s26, 32, %s1079_s7, [#allocation3]  }
 0x2b8   :  { %730 = dma.done.wait [#allocation3], 32  }
 0x2b9   :  { %731 = vsyncadd [#allocation3], 4294967264 }
 0x2ba   :  { %451 = vsyncpa [#allocation3], 1 }

</bundles_post_ra>
